<compile_context>
chip_gen: v6e
topology: v6e:2x2x1
jax: 0.10.0
libtpu: 0.0.40
codegen_flags: <defaults>
</compile_context>

<pallas_src>
import functools

import jax
import jax.numpy as jnp
from jax.experimental import pallas as pl
from jax.experimental.pallas import tpu as pltpu


# Kernel layouts (channel-major, matching PyTorch NCL / NCHW):
#   xp  : (Bn, C, L + g2 - 1)  block of pre-padded inputs (Conv1d 'same' pad)
#   w1f : (C, g2*C)            folded Conv1d weight, [o, k*C + i] = w1[o, i, k]
#   w2t : (g3, OC, ap)         Conv2d weight, tap-major, [k, o, a] = w2[o, 0, a, k]
#   b2  : (OC, 1)              Conv2d bias
#   out : (Bn, OC, cp*L)       lane-dense slab; memory-identical to (Bn, OC, cp, L)
def cell_a_kernel(xp_ref, w1f_ref, w2t_ref, b2_ref, o_ref, *, cp, ap, g2, g3, L, Bn):
    C = cp * ap
    OC = w2t_ref.shape[1]
    padA = (g3 - 1) // 2

    w1f = w1f_ref[...]                                        # (C, g2*C)

    res = []
    for b in range(Bn):                                       # static, small unroll
        xb = xp_ref[b]                                        # (C, L + g2 - 1)

        # ---- Conv1d 'same', no bias: taps folded into K -> single matmul ----
        x_im = jnp.concatenate([xb[:, k:k + L] for k in range(g2)], axis=0)  # (g2*C, L)
        y = jnp.dot(w1f, x_im, preferred_element_type=jnp.float32)           # (C, L)

        # ---- squash (per-channel norm over L); one reciprocal, no divides ----
        sq = jnp.sum(y * y, axis=-1, keepdims=True)                          # (C, 1)
        y = y * (sq * pl.reciprocal((1.0 + sq) * (sq + 1e-8), approx=False))

        # ---- Conv2d: in_ch=1, kernel (ap, g3), stride (ap, 1), pad (0, padA) ----
        # cp merged into RHS columns: one (OC, ap)@(ap, cp*L) matmul per tap.
        if padA > 0:
            zpad = jnp.zeros((C, padA), jnp.float32)
            y = jnp.concatenate([zpad, y, zpad], axis=-1)                    # (C, L+g3-1)
        row_blocks = [y[p * ap:(p + 1) * ap, :] for p in range(cp)]          # cp x (ap, *)
        acc = jnp.zeros((OC, cp * L), jnp.float32)
        for k in range(g3):
            rhs_k = jnp.concatenate([blk[:, k:k + L] for blk in row_blocks],
                                    axis=1)                                  # (ap, cp*L)
            acc = acc + jnp.dot(w2t_ref[k], rhs_k,
                                preferred_element_type=jnp.float32)          # (OC, cp*L)
        res.append(acc)

    # Single lane-dense store for the whole block; bias broadcast added once.
    out = jnp.stack(res, axis=0) + b2_ref[...][None, :, :]                   # (Bn, OC, cp*L)
    o_ref[...] = out.astype(o_ref.dtype)


def cell_a_forward(x, w1, w2, b2, *, cp, ap, g2, g3, block_n=2):
    """x: (N, C, L), w1: (C, C, g2), w2: (OC, 1, ap, g3), b2: (OC,)."""
    N, C, L = x.shape
    assert C == cp * ap, "[cp * ap] must equal [C]"
    assert g3 % 2 == 1, "[g3] needs to be odd"
    OC = w2.shape[0]

    # 'same' padding for the Conv1d (matches PyTorch: left = total//2).
    pad_total = g2 - 1
    pad_l = pad_total // 2
    pad_r = pad_total - pad_l
    xp = jnp.pad(x.astype(jnp.float32), ((0, 0), (0, 0), (pad_l, pad_r)))
    Lp = L + pad_total

    # Pack Bn samples per grid step (pad N up if needed); keeps grid >= 2 on v7x.
    Bn = max(1, min(block_n, N))
    n_pad = (-N) % Bn
    if n_pad:
        xp = jnp.pad(xp, ((0, n_pad), (0, 0), (0, 0)))
    n_grid = (N + n_pad) // Bn

    # Fold / reorder conv weights once in the wrapper (not per grid step).
    w1f = jnp.transpose(w1, (0, 2, 1)).reshape(C, g2 * C).astype(jnp.float32)   # [o, k*C+i]
    w2t = jnp.transpose(w2.reshape(OC, ap, g3), (2, 0, 1)).astype(jnp.float32)  # (g3, OC, ap)
    b2_2d = b2.reshape(OC, 1).astype(jnp.float32)

    kernel = functools.partial(cell_a_kernel, cp=cp, ap=ap, g2=g2, g3=g3, L=L, Bn=Bn)
    out = pl.pallas_call(
        kernel,
        out_shape=jax.ShapeDtypeStruct((N + n_pad, OC, cp * L), jnp.float32),
        grid_spec=pltpu.PrefetchScalarGridSpec(
            num_scalar_prefetch=0,
            grid=(n_grid,),
            in_specs=[
                pl.BlockSpec((Bn, C, Lp), lambda n: (n, 0, 0)),
                pl.BlockSpec((C, g2 * C), lambda n: (0, 0)),
                pl.BlockSpec((g3, OC, ap), lambda n: (0, 0, 0)),
                pl.BlockSpec((OC, 1), lambda n: (0, 0)),
            ],
            out_specs=pl.BlockSpec((Bn, OC, cp * L), lambda n: (n, 0, 0)),
        ),
        compiler_params=pltpu.CompilerParams(dimension_semantics=("parallel",)),
    )(xp, w1f, w2t, b2_2d)

    # (N, OC, cp*L) is memory-identical to PyTorch's (N, OC, cp, L): free reshape,
    # no wrapper transpose / extra HBM pass.
    out = out[:N].reshape(N, OC, cp, L)
    return out.astype(x.dtype)


def cell_a_reference(x, w1, w2, b2, *, cp, ap, g2, g3):
    """Pure-JAX reference mirroring the PyTorch forward."""
    pad_total = g2 - 1
    pad_l = pad_total // 2
    pad_r = pad_total - pad_l
    y = jax.lax.conv_general_dilated(
        x, w1, window_strides=(1,), padding=[(pad_l, pad_r)],
        dimension_numbers=("NCH", "OIH", "NCH"),
        precision=jax.lax.Precision.HIGHEST)
    sq = jnp.sum(y ** 2, axis=-1, keepdims=True)
    y = (sq / (1.0 + sq)) * y / (sq + 1e-8)
    y = y[:, None, :, :]
    padA = (g3 - 1) // 2
    out = jax.lax.conv_general_dilated(
        y, w2, window_strides=(ap, 1), padding=[(0, 0), (padA, padA)],
        dimension_numbers=("NCHW", "OIHW", "NCHW"),
        precision=jax.lax.Precision.HIGHEST)
    return out + b2[None, :, None, None]


if __name__ == "__main__":
    # Small shapes consistent with the module.
    cp, ap, g2 = 2, 4, 3          # Conv1d: C = cp*ap = 8 channels, kernel g2=3
    cSA, aSA, g3 = 2, 2, 3        # Conv2d: OC = cSA*aSA = 4, kernel (ap, g3), g3 odd
    N, L = 4, 16                  # N=4 with Bn=2 -> grid of 2 (exercises batch packing)
    C = cp * ap
    OC = cSA * aSA

    key = jax.random.PRNGKey(0)
    kx, kw1, kw2, kb2 = jax.random.split(key, 4)
    x = jax.random.normal(kx, (N, C, L), jnp.float32)
    w1 = jax.random.normal(kw1, (C, C, g2), jnp.float32) * (1.0 / (C * g2) ** 0.5)
    w2 = jax.random.normal(kw2, (OC, 1, ap, g3), jnp.float32) * (1.0 / (ap * g3) ** 0.5)
    b2 = jax.random.normal(kb2, (OC,), jnp.float32) * 0.1

    out = jax.block_until_ready(
        cell_a_forward(x, w1, w2, b2, cp=cp, ap=ap, g2=g2, g3=g3, block_n=2))
    ref = cell_a_reference(x, w1, w2, b2, cp=cp, ap=ap, g2=g2, g3=g3)

    assert out.shape == (N, OC, cp, L), out.shape
    assert jnp.allclose(out, ref, rtol=1e-3, atol=1e-4), float(jnp.max(jnp.abs(out - ref)))
    print("KERNEL_OK")
</pallas_src>

<mosaic_0001>
module attributes {stable_mosaic.version = 11 : i64} {
  func.func @cell_a_kernel(%arg0: i32, %arg1: memref<2x8x18xf32, #tpu.memory_space<vmem>>, %arg2: memref<8x24xf32, #tpu.memory_space<vmem>>, %arg3: memref<3x4x4xf32, #tpu.memory_space<vmem>>, %arg4: memref<4x1xf32, #tpu.memory_space<vmem>>, %arg5: memref<2x4x32xf32, #tpu.memory_space<vmem>>) attributes {dimension_semantics = [#tpu.dimension_semantics<parallel>], iteration_bounds = array<i64: 2>, scalar_prefetch = 0 : i64, scratch_operands = 0 : i64, tpu.core_type = #tpu.core_type<tc>, window_params = [{transform_indices = @transform_0, window_bounds = array<i64: 2, 8, 18>}, {pipeline_mode = #tpu.pipeline_mode<synchronous>, transform_indices = @transform_1, window_bounds = array<i64: 8, 24>}, {pipeline_mode = #tpu.pipeline_mode<synchronous>, transform_indices = @transform_2, window_bounds = array<i64: 3, 4, 4>}, {pipeline_mode = #tpu.pipeline_mode<synchronous>, transform_indices = @transform_3, window_bounds = array<i64: 4, 1>}, {transform_indices = @transform_4, window_bounds = array<i64: 2, 4, 32>}]} {
    %c0 = arith.constant 0 : index
    %c0_0 = arith.constant 0 : index
    %0 = vector.load %arg2[%c0, %c0_0] : memref<8x24xf32, #tpu.memory_space<vmem>>, vector<8x24xf32>
    %c0_1 = arith.constant 0 : index
    %c0_2 = arith.constant 0 : index
    %c0_3 = arith.constant 0 : index
    %1 = vector.load %arg1[%c0_1, %c0_2, %c0_3] : memref<2x8x18xf32, #tpu.memory_space<vmem>>, vector<1x8x18xf32>
    %2 = vector.shape_cast %1 : vector<1x8x18xf32> to vector<8x18xf32>
    %3 = vector.extract_strided_slice %2 {offsets = [0, 0], sizes = [8, 16], strides = [1, 1]} : vector<8x18xf32> to vector<8x16xf32>
    %4 = vector.extract_strided_slice %2 {offsets = [0, 1], sizes = [8, 16], strides = [1, 1]} : vector<8x18xf32> to vector<8x16xf32>
    %5 = vector.extract_strided_slice %2 {offsets = [0, 2], sizes = [8, 16], strides = [1, 1]} : vector<8x18xf32> to vector<8x16xf32>
    %6 = tpu.concatenate %3, %4, %5 in 0 : vector<8x16xf32>, vector<8x16xf32>, vector<8x16xf32> -> vector<24x16xf32>
    %cst = arith.constant dense<0.000000e+00> : vector<8x16xf32>
    %7 = tpu.matmul %0, %6, %cst {dimension_numbers = #tpu.dot_dimension_numbers<[1], [0], [0], [1], [0, 0, 1, 1], [], []>} : vector<8x24xf32>, vector<24x16xf32>, vector<8x16xf32> -> vector<8x16xf32>
    %8 = arith.mulf %7, %7 : vector<8x16xf32>
    %cst_4 = arith.constant dense<0.000000e+00> : vector<8xf32>
    %9 = vector.multi_reduction <add>, %8, %cst_4 [1] : vector<8x16xf32> to vector<8xf32>
    %10 = vector.shape_cast %9 : vector<8xf32> to vector<8x1xf32>
    %cst_5 = arith.constant 1.000000e+00 : f32
    %11 = vector.broadcast %cst_5 : f32 to vector<8x1xf32>
    %12 = arith.addf %11, %10 : vector<8x1xf32>
    %cst_6 = arith.constant 9.99999993E-9 : f32
    %13 = vector.broadcast %cst_6 : f32 to vector<8x1xf32>
    %14 = arith.addf %10, %13 : vector<8x1xf32>
    %15 = arith.mulf %12, %14 : vector<8x1xf32>
    %16 = tpu.reciprocal %15 : vector<8x1xf32> -> vector<8x1xf32>
    %17 = arith.mulf %10, %16 : vector<8x1xf32>
    %18 = vector.broadcast %17 : vector<8x1xf32> to vector<8x16xf32>
    %19 = arith.mulf %7, %18 : vector<8x16xf32>
    %cst_7 = arith.constant 0.000000e+00 : f32
    %20 = vector.broadcast %cst_7 : f32 to vector<8x1xf32>
    %21 = tpu.concatenate %20, %19, %20 in 1 : vector<8x1xf32>, vector<8x16xf32>, vector<8x1xf32> -> vector<8x18xf32>
    %22 = vector.extract_strided_slice %21 {offsets = [0, 0], sizes = [4, 18], strides = [1, 1]} : vector<8x18xf32> to vector<4x18xf32>
    %23 = vector.extract_strided_slice %21 {offsets = [4, 0], sizes = [4, 18], strides = [1, 1]} : vector<8x18xf32> to vector<4x18xf32>
    %cst_8 = arith.constant 0.000000e+00 : f32
    %24 = vector.broadcast %cst_8 : f32 to vector<4x32xf32>
    %25 = vector.extract_strided_slice %22 {offsets = [0, 0], sizes = [4, 16], strides = [1, 1]} : vector<4x18xf32> to vector<4x16xf32>
    %26 = vector.extract_strided_slice %23 {offsets = [0, 0], sizes = [4, 16], strides = [1, 1]} : vector<4x18xf32> to vector<4x16xf32>
    %27 = tpu.concatenate %25, %26 in 1 : vector<4x16xf32>, vector<4x16xf32> -> vector<4x32xf32>
    %c0_9 = arith.constant 0 : index
    %c0_10 = arith.constant 0 : index
    %c0_11 = arith.constant 0 : index
    %28 = vector.load %arg3[%c0_9, %c0_10, %c0_11] : memref<3x4x4xf32, #tpu.memory_space<vmem>>, vector<1x4x4xf32>
    %29 = vector.shape_cast %28 : vector<1x4x4xf32> to vector<4x4xf32>
    %cst_12 = arith.constant dense<0.000000e+00> : vector<4x32xf32>
    %30 = tpu.matmul %29, %27, %cst_12 {dimension_numbers = #tpu.dot_dimension_numbers<[1], [0], [0], [1], [0, 0, 1, 1], [], []>} : vector<4x4xf32>, vector<4x32xf32>, vector<4x32xf32> -> vector<4x32xf32>
    %31 = arith.addf %24, %30 : vector<4x32xf32>
    %32 = vector.extract_strided_slice %22 {offsets = [0, 1], sizes = [4, 16], strides = [1, 1]} : vector<4x18xf32> to vector<4x16xf32>
    %33 = vector.extract_strided_slice %23 {offsets = [0, 1], sizes = [4, 16], strides = [1, 1]} : vector<4x18xf32> to vector<4x16xf32>
    %34 = tpu.concatenate %32, %33 in 1 : vector<4x16xf32>, vector<4x16xf32> -> vector<4x32xf32>
    %c1 = arith.constant 1 : index
    %c0_13 = arith.constant 0 : index
    %c0_14 = arith.constant 0 : index
    %35 = vector.load %arg3[%c1, %c0_13, %c0_14] : memref<3x4x4xf32, #tpu.memory_space<vmem>>, vector<1x4x4xf32>
    %36 = vector.shape_cast %35 : vector<1x4x4xf32> to vector<4x4xf32>
    %cst_15 = arith.constant dense<0.000000e+00> : vector<4x32xf32>
    %37 = tpu.matmul %36, %34, %cst_15 {dimension_numbers = #tpu.dot_dimension_numbers<[1], [0], [0], [1], [0, 0, 1, 1], [], []>} : vector<4x4xf32>, vector<4x32xf32>, vector<4x32xf32> -> vector<4x32xf32>
    %38 = arith.addf %31, %37 : vector<4x32xf32>
    %39 = vector.extract_strided_slice %22 {offsets = [0, 2], sizes = [4, 16], strides = [1, 1]} : vector<4x18xf32> to vector<4x16xf32>
    %40 = vector.extract_strided_slice %23 {offsets = [0, 2], sizes = [4, 16], strides = [1, 1]} : vector<4x18xf32> to vector<4x16xf32>
    %41 = tpu.concatenate %39, %40 in 1 : vector<4x16xf32>, vector<4x16xf32> -> vector<4x32xf32>
    %c2 = arith.constant 2 : index
    %c0_16 = arith.constant 0 : index
    %c0_17 = arith.constant 0 : index
    %42 = vector.load %arg3[%c2, %c0_16, %c0_17] : memref<3x4x4xf32, #tpu.memory_space<vmem>>, vector<1x4x4xf32>
    %43 = vector.shape_cast %42 : vector<1x4x4xf32> to vector<4x4xf32>
    %cst_18 = arith.constant dense<0.000000e+00> : vector<4x32xf32>
    %44 = tpu.matmul %43, %41, %cst_18 {dimension_numbers = #tpu.dot_dimension_numbers<[1], [0], [0], [1], [0, 0, 1, 1], [], []>} : vector<4x4xf32>, vector<4x32xf32>, vector<4x32xf32> -> vector<4x32xf32>
    %45 = arith.addf %38, %44 : vector<4x32xf32>
    %c1_19 = arith.constant 1 : index
    %c0_20 = arith.constant 0 : index
    %c0_21 = arith.constant 0 : index
    %46 = vector.load %arg1[%c1_19, %c0_20, %c0_21] : memref<2x8x18xf32, #tpu.memory_space<vmem>>, vector<1x8x18xf32>
    %47 = vector.shape_cast %46 : vector<1x8x18xf32> to vector<8x18xf32>
    %48 = vector.extract_strided_slice %47 {offsets = [0, 0], sizes = [8, 16], strides = [1, 1]} : vector<8x18xf32> to vector<8x16xf32>
    %49 = vector.extract_strided_slice %47 {offsets = [0, 1], sizes = [8, 16], strides = [1, 1]} : vector<8x18xf32> to vector<8x16xf32>
    %50 = vector.extract_strided_slice %47 {offsets = [0, 2], sizes = [8, 16], strides = [1, 1]} : vector<8x18xf32> to vector<8x16xf32>
    %51 = tpu.concatenate %48, %49, %50 in 0 : vector<8x16xf32>, vector<8x16xf32>, vector<8x16xf32> -> vector<24x16xf32>
    %cst_22 = arith.constant dense<0.000000e+00> : vector<8x16xf32>
    %52 = tpu.matmul %0, %51, %cst_22 {dimension_numbers = #tpu.dot_dimension_numbers<[1], [0], [0], [1], [0, 0, 1, 1], [], []>} : vector<8x24xf32>, vector<24x16xf32>, vector<8x16xf32> -> vector<8x16xf32>
    %53 = arith.mulf %52, %52 : vector<8x16xf32>
    %cst_23 = arith.constant dense<0.000000e+00> : vector<8xf32>
    %54 = vector.multi_reduction <add>, %53, %cst_23 [1] : vector<8x16xf32> to vector<8xf32>
    %55 = vector.shape_cast %54 : vector<8xf32> to vector<8x1xf32>
    %cst_24 = arith.constant 1.000000e+00 : f32
    %56 = vector.broadcast %cst_24 : f32 to vector<8x1xf32>
    %57 = arith.addf %56, %55 : vector<8x1xf32>
    %cst_25 = arith.constant 9.99999993E-9 : f32
    %58 = vector.broadcast %cst_25 : f32 to vector<8x1xf32>
    %59 = arith.addf %55, %58 : vector<8x1xf32>
    %60 = arith.mulf %57, %59 : vector<8x1xf32>
    %61 = tpu.reciprocal %60 : vector<8x1xf32> -> vector<8x1xf32>
    %62 = arith.mulf %55, %61 : vector<8x1xf32>
    %63 = vector.broadcast %62 : vector<8x1xf32> to vector<8x16xf32>
    %64 = arith.mulf %52, %63 : vector<8x16xf32>
    %cst_26 = arith.constant 0.000000e+00 : f32
    %65 = vector.broadcast %cst_26 : f32 to vector<8x1xf32>
    %66 = tpu.concatenate %65, %64, %65 in 1 : vector<8x1xf32>, vector<8x16xf32>, vector<8x1xf32> -> vector<8x18xf32>
    %67 = vector.extract_strided_slice %66 {offsets = [0, 0], sizes = [4, 18], strides = [1, 1]} : vector<8x18xf32> to vector<4x18xf32>
    %68 = vector.extract_strided_slice %66 {offsets = [4, 0], sizes = [4, 18], strides = [1, 1]} : vector<8x18xf32> to vector<4x18xf32>
    %cst_27 = arith.constant 0.000000e+00 : f32
    %69 = vector.broadcast %cst_27 : f32 to vector<4x32xf32>
    %70 = vector.extract_strided_slice %67 {offsets = [0, 0], sizes = [4, 16], strides = [1, 1]} : vector<4x18xf32> to vector<4x16xf32>
    %71 = vector.extract_strided_slice %68 {offsets = [0, 0], sizes = [4, 16], strides = [1, 1]} : vector<4x18xf32> to vector<4x16xf32>
    %72 = tpu.concatenate %70, %71 in 1 : vector<4x16xf32>, vector<4x16xf32> -> vector<4x32xf32>
    %c0_28 = arith.constant 0 : index
    %c0_29 = arith.constant 0 : index
    %c0_30 = arith.constant 0 : index
    %73 = vector.load %arg3[%c0_28, %c0_29, %c0_30] : memref<3x4x4xf32, #tpu.memory_space<vmem>>, vector<1x4x4xf32>
    %74 = vector.shape_cast %73 : vector<1x4x4xf32> to vector<4x4xf32>
    %cst_31 = arith.constant dense<0.000000e+00> : vector<4x32xf32>
    %75 = tpu.matmul %74, %72, %cst_31 {dimension_numbers = #tpu.dot_dimension_numbers<[1], [0], [0], [1], [0, 0, 1, 1], [], []>} : vector<4x4xf32>, vector<4x32xf32>, vector<4x32xf32> -> vector<4x32xf32>
    %76 = arith.addf %69, %75 : vector<4x32xf32>
    %77 = vector.extract_strided_slice %67 {offsets = [0, 1], sizes = [4, 16], strides = [1, 1]} : vector<4x18xf32> to vector<4x16xf32>
    %78 = vector.extract_strided_slice %68 {offsets = [0, 1], sizes = [4, 16], strides = [1, 1]} : vector<4x18xf32> to vector<4x16xf32>
    %79 = tpu.concatenate %77, %78 in 1 : vector<4x16xf32>, vector<4x16xf32> -> vector<4x32xf32>
    %c1_32 = arith.constant 1 : index
    %c0_33 = arith.constant 0 : index
    %c0_34 = arith.constant 0 : index
    %80 = vector.load %arg3[%c1_32, %c0_33, %c0_34] : memref<3x4x4xf32, #tpu.memory_space<vmem>>, vector<1x4x4xf32>
    %81 = vector.shape_cast %80 : vector<1x4x4xf32> to vector<4x4xf32>
    %cst_35 = arith.constant dense<0.000000e+00> : vector<4x32xf32>
    %82 = tpu.matmul %81, %79, %cst_35 {dimension_numbers = #tpu.dot_dimension_numbers<[1], [0], [0], [1], [0, 0, 1, 1], [], []>} : vector<4x4xf32>, vector<4x32xf32>, vector<4x32xf32> -> vector<4x32xf32>
    %83 = arith.addf %76, %82 : vector<4x32xf32>
    %84 = vector.extract_strided_slice %67 {offsets = [0, 2], sizes = [4, 16], strides = [1, 1]} : vector<4x18xf32> to vector<4x16xf32>
    %85 = vector.extract_strided_slice %68 {offsets = [0, 2], sizes = [4, 16], strides = [1, 1]} : vector<4x18xf32> to vector<4x16xf32>
    %86 = tpu.concatenate %84, %85 in 1 : vector<4x16xf32>, vector<4x16xf32> -> vector<4x32xf32>
    %c2_36 = arith.constant 2 : index
    %c0_37 = arith.constant 0 : index
    %c0_38 = arith.constant 0 : index
    %87 = vector.load %arg3[%c2_36, %c0_37, %c0_38] : memref<3x4x4xf32, #tpu.memory_space<vmem>>, vector<1x4x4xf32>
    %88 = vector.shape_cast %87 : vector<1x4x4xf32> to vector<4x4xf32>
    %cst_39 = arith.constant dense<0.000000e+00> : vector<4x32xf32>
    %89 = tpu.matmul %88, %86, %cst_39 {dimension_numbers = #tpu.dot_dimension_numbers<[1], [0], [0], [1], [0, 0, 1, 1], [], []>} : vector<4x4xf32>, vector<4x32xf32>, vector<4x32xf32> -> vector<4x32xf32>
    %90 = arith.addf %83, %89 : vector<4x32xf32>
    %91 = vector.shape_cast %45 : vector<4x32xf32> to vector<1x4x32xf32>
    %92 = vector.shape_cast %90 : vector<4x32xf32> to vector<1x4x32xf32>
    %93 = tpu.concatenate %91, %92 in 0 : vector<1x4x32xf32>, vector<1x4x32xf32> -> vector<2x4x32xf32>
    %c0_40 = arith.constant 0 : index
    %c0_41 = arith.constant 0 : index
    %94 = vector.load %arg4[%c0_40, %c0_41] : memref<4x1xf32, #tpu.memory_space<vmem>>, vector<4x1xf32>
    %95 = vector.shape_cast %94 : vector<4x1xf32> to vector<1x4x1xf32>
    %96 = vector.broadcast %95 : vector<1x4x1xf32> to vector<2x4x32xf32>
    %97 = arith.addf %93, %96 : vector<2x4x32xf32>
    %c0_42 = arith.constant 0 : index
    %c0_43 = arith.constant 0 : index
    %c0_44 = arith.constant 0 : index
    %98 = vector.load %arg5[%c0_42, %c0_43, %c0_44] : memref<2x4x32xf32, #tpu.memory_space<vmem>>, vector<2x4x32xf32>
    tpu.vector_store %arg5[%c0_42, %c0_43, %c0_44], %97 {strides = array<i32>} : memref<2x4x32xf32, #tpu.memory_space<vmem>>, vector<2x4x32xf32>,
    return
  }
  func.func @transform_0(%arg0: i32) -> (i32, i32, i32) {
    %c0_i32 = arith.constant 0 : i32
    %c0_i32_0 = arith.constant 0 : i32
    %c0_i32_1 = arith.constant 0 : i32
    return %arg0, %c0_i32, %c0_i32_0 : i32, i32, i32
  }
  func.func @transform_1(%arg0: i32) -> (i32, i32) {
    %c0_i32 = arith.constant 0 : i32
    %c0_i32_0 = arith.constant 0 : i32
    %c0_i32_1 = arith.constant 0 : i32
    return %c0_i32, %c0_i32_0 : i32, i32
  }
  func.func @transform_2(%arg0: i32) -> (i32, i32, i32) {
    %c0_i32 = arith.constant 0 : i32
    %c0_i32_0 = arith.constant 0 : i32
    %c0_i32_1 = arith.constant 0 : i32
    %c0_i32_2 = arith.constant 0 : i32
    return %c0_i32, %c0_i32_0, %c0_i32_1 : i32, i32, i32
  }
  func.func @transform_3(%arg0: i32) -> (i32, i32) {
    %c0_i32 = arith.constant 0 : i32
    %c0_i32_0 = arith.constant 0 : i32
    %c0_i32_1 = arith.constant 0 : i32
    return %c0_i32, %c0_i32_0 : i32, i32
  }
  func.func @transform_4(%arg0: i32) -> (i32, i32, i32) {
    %c0_i32 = arith.constant 0 : i32
    %c0_i32_0 = arith.constant 0 : i32
    %c0_i32_1 = arith.constant 0 : i32
    return %arg0, %c0_i32, %c0_i32_0 : i32, i32, i32
  }
}

</mosaic_0001>

<bundles_post_ra>
// kernel: tpu_custom_call.1
= control target key start
LH: loop header
LB: loop body
LE: loop exit
PB: predicated region body
PF: predicated region fallthrough
CT: control target
= control target key end

     0   :  { %s1717_s0 = inlined_call_operand.hbm [shape: f32[4,8,18], index: 0, kind: input, shape index: {}]   ;;  %s1718_s1 = inlined_call_operand.hbm [shape: f32[8,24], index: 1, kind: input, shape index: {}]   ;;  %s1719_s2 = inlined_call_operand.hbm [shape: f32[3,4,4], index: 2, kind: input, shape index: {}]   ;;  %s1720_s3 = inlined_call_operand.vmem [shape: f32[4,1], index: 3, kind: input, shape index: {}]   ;;  %s1721_s4 = inlined_call_operand.hbm [shape: f32[4,4,32], index: 4, kind: output, shape index: {}]  }
   0x1   :  { %1726 = sst [smem:[#allocation12_spill]] %s1718_s1 }
   0x2   :  { %9 = vsyncpa [#allocation3], 0 }
   0x3   :  { %11 = vsyncpa [#allocation3 + $0x1], 0 }
   0x4   :  { %12 = vsyncpa [#allocation6], 0 }
   0x5   :  { %13 = vsyncpa [#allocation4], 0 }
   0x6   :  { %15 = vsyncpa [#allocation4 + $0x1], 0  ;;  %s1439_s15 = smov 0   ;;  %s1441_s16 = smov 0  }
   0x7   :  { %s1443_s17 = smov 0   ;;  %s1445_s18 = smov 0  }
   0x8 LB: > { %s1460_s19 = sadd.s32 4294967295, %s1393_s18   ;;  %s1055_s20 = sadd.s32 4294967294, %s1393_s18   ;;  %s1393_s18 = sphi %s1445_s18, %s1746_s18   ;;  %s1389_s17 = sphi %s1443_s17, %s1745_s17   ;;  %s1385_s16 = sphi %s1441_s16, %s1744_s16   ;;  %s1381_s15 = sphi %s1439_s15, %s1743_s15  }
   0x9   : > { %s1464_s21 = sadd.s32 1, %s1393_s18   ;;  %s28_s22 = sadd.s32 1, %s1389_s17 }
   0xa   : > { %s25_s23 = ssub.s32 %s1393_s18, %s1464_s21  ;;  %p35_p0 = scmp.ne.s32.totalorder %s1389_s17, %s1385_s16 }
   0xb   : > { %p26_p1 = scmp.eq.s32.totalorder %s25_s23, 0  ;;  %p36_p2 = scmp.eq.s32.totalorder %s1393_s18, 0 }
   0xc   : > { %p41_p3 = scmp.ne.s32.totalorder %s1385_s16, %s1381_s15  ;;  %p1722_p4 = scmp.eq.s32.totalorder %s1460_s19, 0 }
   0xd   : > { %s1476_s24 = scalar_select %p26_p1, %s1389_s17, %s28_s22  }
   0xe   : > { %p1478_p5 = por %p36_p2, %p35_p0  ;;  %p1484_p6 = por %p1722_p4, %p41_p3 }
   0xf   : > { %p128_p7 = scmp.eq.s32.totalorder %s1460_s19, 1  ;;  %p134_p8 = scmp.eq.s32.totalorder %s1055_s20, 1 }
  0x10   : > { %s1728_s26 = scalar_select %p1484_p6, 1, 0 }
  0x11   : > { %p1056_p9 = scmp.ge.s32.totalorder %s1393_s18, 1  ;;  %p141_p10 = scmp.lt.s32.totalorder %s1393_s18, 3 }
  0x12   : > { %p1491_p11 = por %p128_p7, %p35_p0  ;;  %p1495_p12 = por %p134_p8, %p41_p3 }
  0x13   : > { %p1499_p13 = pnand %p1056_p9, %p141_p10  ;;  %s1395_s30 = smov [#allocation5]  }
  0x14   : > { %s1729_s27 = scalar_select %p1491_p11, 1, 0 }
  0x15   : > { %s1730_s28 = scalar_select %p1495_p12, 1, 0 }
  0x16   : > { %s1731_s29 = scalar_select %p1499_p13, 1, 0 }
  0x17   : > { %p1170_p2 = pneg %p1499_p13  ;;  %s154_s5 = sshll.u32 %s1395_s30, 4  ;;  %s155_s5 = int_to_ptr.vmem [resolvable:$true] %s154_s5 }
  0x18   : > { %p1187_p4 = scmp.lt.s32.totalorder %s1393_s18, 2  ;;  %p1732_p0 = scmp.eq.s32.totalorder %s1460_s19, 0 }
  0x19   : > { %s1396_s8 = smov [#allocation7]   ;;  %s1256_s10 = scalar_lea.vmem %s155_s5, 128 }
  0x1a   : > { %p1509_p7 = pnand %p1170_p2, %p1732_p0  ;;  %p1515_p3 = pnand %p1187_p4, %p1478_p5 }
  0x1b   : > { %s164_s9 = sshll.u32 %s1396_s8, 4  ;;  %p1257_p9 = scmp.ne.s32.totalorder %s155_s5, %s1256_s10  ;;  %s165_s9 = int_to_ptr.vmem [resolvable:$true] %s164_s9 }
  0x1c   : > { %p1247_p8 = pneg %p1509_p7  ;;  %p1264_p0 = scmp.lt.s32.totalorder %s155_s5, %s155_s5 }
  0x1d   : > { %p1265_p1 = scmp.lt.s32.totalorder %s1256_s10, %s1256_s10 }
  0x1e   : > { %p1259_p10 = pnand %p1257_p9, %p1247_p8 }
  0x1f   : > { %p1266_p12 = por %p1265_p1, %p1264_p0 }
  0x20   : > { %p1260_p2 = pneg %p1259_p10 }
  0x22   : > { %p1267_p11 = pnand %p1266_p12, %p1260_p2 }
  0x24   : > { %1270 = shalt.err (!%p1267_p11)
}
  0x25   : > { %s1735_s1 = sld [smem:[#allocation12_spill]]  ;;  %s181_s13 = sand.u32 1, %s1389_s17  }
  0x26   : > { %s1282_s14 = scalar_lea.vmem %s165_s9, 192  ;;  %p1290_p10 = scmp.lt.s32.totalorder %s165_s9, %s165_s9 }
  0x27   : > { %p1283_p4 = scmp.ne.s32.totalorder %s165_s9, %s1282_s14  ;;  %p1291_p6 = scmp.lt.s32.totalorder %s1282_s14, %s1282_s14 }
  0x29   : > { %p1285_p5 = pnand %p1283_p4, %p1247_p8  ;;  %p1292_p1 = por %p1291_p6, %p1290_p10 }
  0x2b   : > { %1173 = dma.hbm_to_vmem [thread:$0]  (!%p1509_p7), %s1735_s1, 128, %s155_s5, [#allocation6]  }
  0x2c   : > { %p1286_p9 = pneg %p1285_p5 }
  0x2e   : > { %p1293_p12 = pnand %p1292_p1, %p1286_p9 }
  0x30   : > { %1296 = shalt.err (!%p1293_p12)
}
  0x31   : > { %s1397_s20 = smov 64   ;;  %s1398_s22 = smov 4  }
  0x32   : > { %1176 = dma.hbm_to_vmem [thread:$0]  (!%p1509_p7), %s1719_s2, 192, %s165_s9, [#allocation6], %s1397_s20, %s1397_s20, %s1398_s22  }
  0x33   : > { %s1060_s30 = sshll.u32 %s181_s13, 4  ;;  %s1088_s5 = sshll.u32 %s1393_s18, 8 }
  0x34   : > { %s1542_s11 = scalar_lea.hbm %s1717_s0, %s1088_s5  ;;  %s185_s12 = scalar_lea.vmem [#allocation2], %s1060_s30 }
  0x35   : > { %s192_s14 = sshll.u32 %s185_s12, 4  ;;  %s1546_s1 = scalar_lea.sflag [#allocation3], %s181_s13  ;;  %s1544_s14 = int_to_ptr.vmem [resolvable:$true] %s192_s14 }
  0x36   : > { %s1297_s6 = scalar_lea.hbm %s1542_s11, 256  ;;  %p1299_p11 = pneg %p1515_p3 }
  0x37   : > { %p1298_p6 = scmp.ne.s32.totalorder %s1542_s11, %s1297_s6  ;;  %s1302_s22 = scalar_lea.hbm %s1717_s0, 512 }
  0x38   : > { %p1303_p2 = scmp.lt.s32.totalorder %s1542_s11, %s1717_s0  ;;  %p1304_p0 = scmp.lt.s32.totalorder %s1302_s22, %s1297_s6 }
  0x39   : > { %p1300_p7 = pnand %p1299_p11, %p1298_p6 }
  0x3a   : > { %p1305_p4 = por %p1304_p0, %p1303_p2 }
  0x3b   : > { %p1301_p8 = pneg %p1300_p7 }
  0x3d   : > { %p1306_p5 = pnand %p1305_p4, %p1301_p8 }
  0x3f   : > { %1309 = shalt.err (!%p1306_p5)
}
  0x40   : > { %s1310_s13 = scalar_lea.vmem %s1544_s14, 256  ;;  %s1399_s30 = smov [#allocation2]  }
  0x41   : > { %p1311_p9 = scmp.ne.s32.totalorder %s1544_s14, %s1310_s13  ;;  %s1315_s5 = sshll.u32 %s1399_s30, 4  ;;  %s1316_s5 = int_to_ptr.vmem [resolvable:$false] %s1315_s5 }
  0x42   : > { %s1317_s8 = scalar_lea.vmem %s1316_s5, 512  ;;  %p1318_p12 = scmp.lt.s32.totalorder %s1544_s14, %s1316_s5 }
  0x43   : > { %p1313_p10 = pnand %p1311_p9, %p1299_p11  ;;  %p1319_p6 = scmp.lt.s32.totalorder %s1317_s8, %s1310_s13 }
  0x45   : > { %p1314_p1 = pneg %p1313_p10  ;;  %p1320_p7 = por %p1319_p6, %p1318_p12 }
  0x47   : > { %p1321_p13 = pnand %p1320_p7, %p1314_p1 }
  0x49   : > { %1324 = shalt.err (!%p1321_p13)
}
  0x4a   : > { %s1400_s10 = smov 128   ;;  %s1401_s12 = smov 8  }
  0x4b   : > { %1180 = dma.hbm_to_vmem [thread:$0]  (!%p1515_p3), %s1542_s11, 256, %s1544_s14, %s1546_s1, %s1400_s10, %s1400_s10, %s1401_s12  }
  0x4c   : > { %p1736_p11 = scmp.ne.s32.totalorder %s1731_s29, 0 }
  0x4d   : > { %s1570_s6 = sand.u32 (!%p1736_p11), 1, %s1385_s16   ;;  %p1737_p13 = scmp.ne.s32.totalorder (!%p1736_p11), %s1728_s26, 0 }
  0x4e   : > { %204 = sbr.rel (%p1736_p11) target bundleno = 1634 (0x662), region = 36  ;;  %s1064_s9 = sshll.u32 (!%p1736_p11), %s1570_s6, 4 }
  0x4f   : > { %s207_s20 = scalar_lea.sflag (!%p1736_p11), [#allocation3], %s1570_s6  ;;  %s1574_s22 = scalar_lea.vmem (!%p1736_p11), [#allocation2], %s1064_s9 }
  0x53   : > { %1368 = dma.done.wait (%p1737_p13), %s207_s20, 256  }
  0x54   : > { %1370 = vsyncadd (%p1737_p13), %s207_s20, 4294967040  ;;  %p1738_p3 = scmp.eq.s32.totalorder %s1460_s19, 0 }
  0x56   : > { %1372 = dma.done.wait (%p1738_p3), [#allocation6], 320   ;;  %p1739_p8 = pmov %p1738_p3 }
  0x57   : > { %v1402_v0 = vmov 0.0   ;;  %vm1403_vm0 = vmmov 0   ;;  %v246_v1 = vld [vmem:[%s1574_s22] sm:$0xff]  ;;  %s1404_s1 = smov 126   ;;  %s1405_s26 = smov 127   ;;  %vm254_vm1 = vcmask 195584  }
  0x58   : > { %1374 = vsyncadd (%p1739_p8), [#allocation6], 4294966976  ;;  %1110 = vmatprep.subr.mxu0 %v1402_v0  ;;  %1116 = vmatprep.mubr.msk.f32.mxu0 %vm1403_vm0, %v1402_v0  ;;  %v245_v4 = vld [vmem:[#allocation5] sm:$0xff]  ;;  %vm329_vm2 = vcmask 130048   ;;  %s1406_s29 = smov 1   ;;  %v1075_v16 = vld [vmem:[%s1574_s22 + $0x8] sm:$0xff] }
  0x59   : > { %1119 = vmatprep.subr.mxu1 %v1402_v0  ;;  %1121 = vmatprep.mubr.msk.f32.mxu1 %vm1403_vm0, %v1402_v0  ;;  %vm343_vm3 = vcmask 7168   ;;  %vm345_vm4 = vcmask 138240   ;;  %s1407_s7 = smov 15   ;;  %s1408_s11 = smov 16   ;;  %vm367_vm5 = vcmask 1043456   ;;  %vm363_vm6 = vcmask 31744  }
  0x5a   : > { %251 = vrot.lane.b32.xlu0 %v246_v1, %s1404_s1  ;;  %v1609_v23 = vld [vmem:[#allocation7 + $0x4] sm:$0xf]  ;;  %v1618_v26 = vld [vmem:[#allocation7] sm:$0xf]  ;;  %v938_v46 = vld [vmem:[%s1720_s3] sm:$0xf] }
  0x5b   : > { %v1409_v47 = vmov 0   ;;  %s1410_s25 = smov 14   ;;  %v525_v53 = vld [vmem:[#allocation7 + $0x8] sm:$0xf]  ;;  %s1067_s13 = sshll.u32 %s1570_s6, 3  ;;  %vm946_vm7 = vcmask 257024  }
  0x5c   : > { %1240 = vset.pattern.permute.xlu0 %v1409_v47  ;;  %s242_s30 = scalar_lea.vmem [#allocation8], %s1067_s13  ;;  %s1089_s8 = sshll.u32 %s1460_s19, 7 }
  0x5d   : > { %s963_s5 = sshll.u32 %s242_s30, 4  ;;  %s1673_s9 = scalar_lea.hbm %s1721_s4, %s1089_s8  ;;  %s1668_s5 = int_to_ptr.vmem [resolvable:$true] %s963_s5 }
  0x5e   : > { %248 = vrot.lane.b32.xlu0 %v246_v1, %s1405_s26  ;;  %s950_s20 = scalar_lea.sflag [#allocation4], %s1570_s6  ;;  %s1325_s22 = scalar_lea.vmem %s1668_s5, 128 }
  0x5f   : > { %p1326_p2 = scmp.ne.s32.totalorder %s1668_s5, %s1325_s22  ;;  %p1740_p0 = scmp.ne.s32.totalorder %s1729_s27, 0 }
  0x60   : > { %s1411_s19 = smov [#allocation8]  }
  0x61   : > { %p1327_p4 = pnand %p1326_p2, %p1740_p0 }
  0x63   : > { %p1328_p5 = pneg %p1327_p4 }
  0xcc   : > { %v252_v2 = vpop.permute.xlu0 %251 }
  0xcd   : > { %1111 = vmatpush3.msra.mxu0 %v252_v2 }
  0xce   : > { %1112 = vmatprep.subr.mxu0 %v1402_v0 }
  0xd0   : > { %v249_v3 = vpop.permute.xlu0 %248 }
  0xd1   : > { %1113 = vmatpush3.msra.mxu0 %v249_v3 }
  0xd2   : > { %1114 = vmatprep.subr.mxu0 %v1402_v0 }
  0xd3   : > { %1115 = vmatpush3.msra.mxu0 %v246_v1 }
  0xd4   : > { %1117 = vmatmul.mubr.msk.f32.vlgmr.msra.gmra.mxu0 %vm254_vm1, %v245_v4  ;;  %1129 = vmatprep.subr.mxu0 %v1402_v0 }
  0xd5   : > { %1131 = vmatprep.mubr.msk.f32.mxu0 %vm1403_vm0, %v1402_v0 }
 0x194   : > { %v324_v5 = vpop.f32.mrf.mxu0 }
 0x195   : > { %v328_v6 = vmul.f32 %v324_v5, %v324_v5 }
 0x196   : > { %v1118_v7 = vpop.f32.mrf.mxu0 }
 0x197   : > { %v330_v8 = vsel %vm329_vm2, %v328_v6, 0.0 }
 0x198   : > { %331 = vadd.xlane.f32.xlu1 %v330_v8 }
 0x221   : > { %v332_v9 = vpop.xlane.xlu1 %331 }
 0x222   : > { %v333_v10 = vadd.f32 1.0, %v332_v9  ;;  %v334_v11 = vadd.f32 1e-08, %v332_v9 }
 0x224   : > { %v335_v12 = vmul.f32 %v334_v11, %v333_v10 }
 0x226   : > { %1241 = vrcp.f32 %v335_v12 }
 0x233   : > { %v1242_v13 = vpop.eup %1241 }
 0x234   : > { %v337_v14 = vmul.f32 %v1242_v13, %v332_v9 }
 0x236   : > { %v338_v15 = vmul.f32 %v337_v14, %v324_v5 }
 0x238   : > { %340 = vrot.lane.b32.xlu1 %v338_v15, %s1406_s29 }
 0x23c   : > { %606 = vrot.lane.b32.xlu1 %v1075_v16, %s1405_s26 }
 0x2aa   : > { %v341_v17 = vpop.permute.xlu1 %340 }
 0x2ab   : > { %v344_v18 = vsel %vm343_vm3, 0.0, %v341_v17 }
 0x2ac   : > { %v346_v19 = vsel %vm345_vm4, %v344_v18, 0.0 }
 0x2ad   : > { %354 = vrot.lane.b32.xlu0 %v346_v19, %s1405_s26  ;;  %v348_v20 = vrot.slane %v346_v19, 4 }
 0x2ae   : > { %v607_v29 = vpop.permute.xlu1 %606 }
 0x2b1   : > { %357 = vrot.lane.b32.xlu0 %v348_v20, %s1407_s7 }
 0x2b5   : > { %349 = vrot.lane.b32.xlu0 %v348_v20, %s1408_s11 }
 0x2b9   : > { %609 = vrot.lane.b32.xlu0 %v1075_v16, %s1404_s1 }
 0x31f   : > { %v355_v21 = vpop.permute.xlu0 %354 }
 0x323   : > { %v358_v22 = vpop.permute.xlu0 %357 }
 0x324   : > { %v360_v24 = vsel %vm329_vm2, %v355_v21, %v358_v22 }
 0x325   : > { %1120 = vmatpush3.msk.msra.mxu1 %vm367_vm5, %v360_v24 }
 0x326   : > { %1122 = vmatmul.mubr.msk.f32.vlgmr.msra.gmra.mxu1 %vm363_vm6, %v1609_v23  ;;  %1124 = vmatprep.subr.mxu1 %v1402_v0 }
 0x327   : > { %v350_v25 = vpop.permute.xlu0 %349  ;;  %1126 = vmatprep.mubr.msk.f32.mxu1 %vm1403_vm0, %v1402_v0 }
 0x328   : > { %v352_v27 = vsel %vm329_vm2, %v346_v19, %v350_v25 }
 0x329   : > { %1125 = vmatpush3.msk.msra.mxu1 %vm367_vm5, %v352_v27 }
 0x32a   : > { %1127 = vmatmul.mubr.msk.f32.vlgmr.msra.gmra.mxu1 %vm363_vm6, %v1618_v26  ;;  %1134 = vmatprep.subr.mxu1 %v1402_v0 }
 0x32b   : > { %v610_v28 = vpop.permute.xlu0 %609  ;;  %1140 = vmatprep.mubr.msk.f32.mxu1 %vm1403_vm0, %v1402_v0 }
 0x32c   : > { %1135 = vmatpush3.msra.mxu1 %v610_v28 }
 0x32d   : > { %1136 = vmatprep.subr.mxu1 %v1402_v0 }
 0x32e   : > { %1137 = vmatpush3.msra.mxu1 %v607_v29 }
 0x32f   : > { %1138 = vmatprep.subr.mxu1 %v1402_v0 }
 0x330   : > { %1139 = vmatpush3.msra.mxu1 %v1075_v16 }
 0x331   : > { %1141 = vmatmul.mubr.msk.f32.vlgmr.msra.gmra.mxu1 %vm254_vm1, %v245_v4  ;;  %1148 = vmatprep.subr.mxu1 %v1402_v0 }
 0x332   : > { %1150 = vmatprep.mubr.msk.f32.mxu1 %vm1403_vm0, %v1402_v0 }
 0x3e6   : > { %v437_v30 = vpop.f32.mrf.mxu1 }
 0x3e8   : > { %v1123_v31 = vpop.f32.mrf.mxu1 }
 0x3ea   : > { %v513_v32 = vpop.f32.mrf.mxu1 }
 0x3eb   : > { %v514_v33 = vadd.f32 %v513_v32, %v437_v30 }
 0x3ec   : > { %v1128_v34 = vpop.f32.mrf.mxu1 }
 0x3f1   : > { %v678_v35 = vpop.f32.mrf.mxu1 }
 0x3f2   : > { %v682_v36 = vmul.f32 %v678_v35, %v678_v35 }
 0x3f3   : > { %v1142_v37 = vpop.f32.mrf.mxu1 }
 0x3f4   : > { %v683_v38 = vsel %vm329_vm2, %v682_v36, 0.0 }
 0x3f5   : > { %684 = vadd.xlane.f32.xlu0 %v683_v38 }
 0x40b   : > { %941 = vperm.xlu0 %1240, %v938_v46  }
 0x47e   : > { %v685_v39 = vpop.xlane.xlu0 %684 }
 0x47f   : > { %v686_v40 = vadd.f32 1.0, %v685_v39  ;;  %v687_v41 = vadd.f32 1e-08, %v685_v39 }
 0x481   : > { %v688_v42 = vmul.f32 %v687_v41, %v686_v40 }
 0x483   : > { %1243 = vrcp.f32 %v688_v42 }
 0x486   : > { %v942_v2 = vpop.permute.xlu0 %941 }
 0x490   : > { %v1244_v43 = vpop.eup %1243 }
 0x491   : > { %v690_v44 = vmul.f32 %v1244_v43, %v685_v39 }
 0x493   : > { %v691_v45 = vmul.f32 %v690_v44, %v678_v35 }
 0x495   : > { %693 = vrot.lane.b32.xlu1 %v691_v45, %s1406_s29 }
 0x499   : > { %517 = vrot.lane.b32.xlu1 %v346_v19, %s1404_s1 }
 0x49d   : > { %520 = vrot.lane.b32.xlu1 %v348_v20, %s1410_s25 }
 0x507   : > { %v694_v48 = vpop.permute.xlu1 %693 }
 0x508   : > { %v696_v49 = vsel %vm343_vm3, 0.0, %v694_v48 }
 0x509   : > { %v697_v50 = vsel %vm345_vm4, %v696_v49, 0.0 }
 0x50a   : > { %704 = vrot.lane.b32.xlu1 %v697_v50, %s1405_s26  ;;  %v699_v55 = vrot.slane %v697_v50, 4 }
 0x50b   : > { %v518_v51 = vpop.permute.xlu1 %517 }
 0x50e   : > { %857 = vrot.lane.b32.xlu1 %v697_v50, %s1404_s1  ;;  %s1329_s1 = sshll.u32 %s1411_s19, 4  ;;  %s1330_s1 = int_to_ptr.vmem [resolvable:$false] %s1329_s1 }
 0x50f   : > { %v521_v52 = vpop.permute.xlu1 %520  ;;  %s1331_s26 = scalar_lea.vmem %s1330_s1, 256  ;;  %p1332_p9 = scmp.lt.s32.totalorder %s1668_s5, %s1330_s1 }
 0x510   : > { %v523_v54 = vsel %vm329_vm2, %v518_v51, %v521_v52  ;;  %p1333_p10 = scmp.lt.s32.totalorder %s1331_s26, %s1325_s22 }
 0x511   : > { %1130 = vmatpush3.msk.msra.mxu0 %vm367_vm5, %v523_v54 }
 0x512   : > { %707 = vrot.lane.b32.xlu1 %v699_v55, %s1407_s7  ;;  %1132 = vmatmul.mubr.msk.f32.vlgmr.msra.gmra.mxu0 %vm363_vm6, %v525_v53  ;;  %p1334_p1 = por %p1333_p10, %p1332_p9 }
 0x513   : > { %1143 = vmatprep.subr.mxu0 %v1402_v0  ;;  %1145 = vmatprep.mubr.msk.f32.mxu0 %vm1403_vm0, %v1402_v0 }
 0x514   : > { %p1335_p12 = pnand %p1334_p1, %p1328_p5 }
 0x516   : > { %700 = vrot.lane.b32.xlu1 %v699_v55, %s1408_s11 }
 0x51a   : > { %860 = vrot.lane.b32.xlu1 %v699_v55, %s1410_s25 }
 0x57c   : > { %v705_v56 = vpop.permute.xlu1 %704 }
 0x580   : > { %v858_v57 = vpop.permute.xlu1 %857 }
 0x584   : > { %v708_v58 = vpop.permute.xlu1 %707 }
 0x585   : > { %v710_v59 = vsel %vm329_vm2, %v705_v56, %v708_v58 }
 0x586   : > { %1144 = vmatpush3.msk.msra.mxu0 %vm367_vm5, %v710_v59 }
 0x587   : > { %1146 = vmatmul.mubr.msk.f32.vlgmr.msra.gmra.mxu0 %vm363_vm6, %v1609_v23  ;;  %1153 = vmatprep.subr.mxu0 %v1402_v0 }
 0x588   : > { %v701_v60 = vpop.permute.xlu1 %700  ;;  %1155 = vmatprep.mubr.msk.f32.mxu0 %vm1403_vm0, %v1402_v0 }
 0x589   : > { %v703_v61 = vsel %vm329_vm2, %v697_v50, %v701_v60 }
 0x58a   : > { %1149 = vmatpush3.msk.msra.mxu1 %vm367_vm5, %v703_v61 }
 0x58b   : > { %1151 = vmatmul.mubr.msk.f32.vlgmr.msra.gmra.mxu1 %vm363_vm6, %v1618_v26 }
 0x58c   : > { %v861_v62 = vpop.permute.xlu1 %860 }
 0x58d   : > { %v863_v63 = vsel %vm329_vm2, %v858_v57, %v861_v62 }
 0x58e   : > { %1154 = vmatpush3.msk.msra.mxu0 %vm367_vm5, %v863_v63 }
 0x58f   : > { %1156 = vmatmul.mubr.msk.f32.vlgmr.msra.gmra.mxu0 %vm363_vm6, %v525_v53 }
 0x5d2   : > { %v598_v1 = vpop.f32.mrf.mxu0 }
 0x5d3   : > { %v602_v3 = vadd.f32 %v598_v1, %v514_v33 }
 0x5d4   : > { %v1133_v0 = vpop.f32.mrf.mxu0 }
 0x5d5   : > { %v944_v4 = vadd.f32 %v942_v2, %v602_v3 }
 0x5d7   : > { %947 = vst.msk [vmem:[%s242_s30] sm:$0xf] %vm946_vm7, %v944_v4 }
 0x647   : > { %v780_v5 = vpop.f32.mrf.mxu0 }
 0x649   : > { %v1147_v6 = vpop.f32.mrf.mxu0 }
 0x64b   : > { %v853_v7 = vpop.f32.mrf.mxu1 }
 0x64c   : > { %v854_v9 = vadd.f32 %v853_v7, %v780_v5 }
 0x64d   : > { %v1152_v8 = vpop.f32.mrf.mxu1 }
 0x64f   : > { %v933_v10 = vpop.f32.mrf.mxu0 }
 0x650   : > { %v937_v11 = vadd.f32 %v933_v10, %v854_v9 }
 0x651   : > { %v1157_v12 = vpop.f32.mrf.mxu0 }
 0x652   : > { %v945_v13 = vadd.f32 %v942_v2, %v937_v11 }
 0x654   : > { %948 = vst.msk [vmem:[%s242_s30 + $0x4] sm:$0xf] %vm946_vm7, %v945_v13 }
 0x655   : > { %1338 = shalt.err (!%p1335_p12)
}
 0x656   : > { %s1339_s29 = scalar_lea.hbm %s1673_s9, 128  ;;  %s1343_s14 = scalar_lea.hbm %s1721_s4, 256 }
 0x657   : > { %p1340_p6 = scmp.ne.s32.totalorder %s1673_s9, %s1339_s29  ;;  %p1344_p13 = scmp.lt.s32.totalorder %s1673_s9, %s1721_s4 }
 0x658   : > { %p1345_p3 = scmp.lt.s32.totalorder %s1343_s14, %s1339_s29 }
 0x659   : > { %p1341_p7 = pnand %p1340_p6, %p1740_p0 }
 0x65a   : > { %p1346_p8 = por %p1345_p3, %p1344_p13 }
 0x65b   : > { %p1342_p11 = pneg %p1341_p7 }
 0x65d   : > { %p1347_p2 = pnand %p1346_p8, %p1342_p11 }
 0x65f   : > { %1350 = shalt.err (!%p1347_p2)
}
 0x660   : > { %s1412_s13 = smov 64   ;;  %s1413_s30 = smov 4  }
 0x661   : > { %1168 = dma.vmem_to_hbm [thread:$0]  (%p1740_p0), %s1668_s5, 128, %s1673_s9, %s950_s20, %s1412_s13, %s1412_s13, %s1413_s30  }
 0x662 PF: > { %s978_s8 = sand.u32 1, %s1381_s15   ;;  %p1741_p4 = scmp.ne.s32.totalorder %s1730_s28, 0 }
 0x663   : > { %p1742_p5 = scmp.ge.s32.totalorder %s1393_s18, 2  ;;  %s979_s10 = scalar_lea.sflag [#allocation4], %s978_s8 }
 0x665   : > { %p1182_p9 = pnand %p1742_p5, %p1741_p4 }
 0x667   : > { %p1183_p10 = pneg %p1182_p9 }
 0x669   : > { %1376 = dma.done.wait (%p1183_p10), %s979_s10, 128  }
 0x66a   : > { %1378 = vsyncadd (%p1183_p10), %s979_s10, 4294967168  ;;  %p18_p1 = scmp.ge.s32.totalorder %s1464_s21, 4   ;;  %s1743_s15 = smov %s1385_s16 }
 0x66b   : > { %s1744_s16 = smov %s1389_s17  ;;  %s1745_s17 = smov %s1476_s24 }
 0x66c   : > { %s1746_s18 = smov %s1464_s21  ;;  %20 = sbr.rel (!%p18_p1) target bundleno = 8 (0x8), region = 92 }
 0x671   :  { %984 = vsyncpa [#allocation3], 1 }
 0x672   :  { %986 = vsyncpa [#allocation3 + $0x1], 1 }
 0x673   :  { %987 = vsyncpa [#allocation6], 1 }
 0x674   :  { %988 = vsyncpa [#allocation4], 1 }
 0x675   :  { %990 = vsyncpa [#allocation4 + $0x1], 1 }

</bundles_post_ra>
